<compile_context>
chip_gen: v6e
topology: v6e:2x2x1
jax: 0.10.0
libtpu: 0.0.40
codegen_flags: <defaults>
</compile_context>

<pallas_src>
import functools

import jax
import jax.numpy as jnp
from jax.experimental import pallas as pl
from jax.experimental.pallas import tpu as pltpu


def _round_up(x, m):
    return ((x + m - 1) // m) * m


_TILE_CANDIDATES = (2048, 1024, 768, 512, 384, 256, 128, 64, 32, 16, 8)


def _pick_tile(dim, cap):
    """Largest MXU-friendly candidate <= cap that divides `dim` (fallback: dim)."""
    for c in _TILE_CANDIDATES:
        if c <= cap and c <= dim and dim % c == 0:
            return c
    return dim


def _tpu_vmem_capacity():
    """Generation-aware VMEM capacity (v5e/v6e 128 MiB, v7x 64 MiB per core)."""
    try:
        return int(pltpu.get_tpu_info().vmem_capacity_bytes)
    except Exception:
        return 64 * 1024 * 1024  # conservative (v7x per-core) fallback


# ---------------------------------------------------------------------------
# Kernels
# ---------------------------------------------------------------------------

def _linear_kernel(x_ref, w_ref, b_ref, o_ref, *, compute_dtype):
    # Collapsed-K path: one clean (tm, K) @ (K, tn) MXU contraction per output
    # tile, bias folded into the single lane-dense store.  No accumulator scratch.
    acc = jnp.dot(x_ref[...].astype(compute_dtype), w_ref[...],
                  preferred_element_type=jnp.float32)
    o_ref[...] = acc + b_ref[...]


def _linear_kernel_ktiled(x_ref, w_ref, b_ref, o_ref, *, compute_dtype):
    # K-tiled path: the f32 output block stays resident across the innermost K
    # axis, is seeded with the broadcast bias at k == 0 and accumulated into
    # directly — no scratch accumulator and no epilogue bias add / copy.
    k = pl.program_id(2)

    @pl.when(k == 0)
    def _():
        o_ref[...] = jnp.broadcast_to(b_ref[...], o_ref.shape)

    o_ref[...] += jnp.dot(x_ref[...].astype(compute_dtype), w_ref[...],
                          preferred_element_type=jnp.float32)


# ---------------------------------------------------------------------------
# Load-time parameter preparation (one-time, NOT per forward call)
# ---------------------------------------------------------------------------

def prepare_linear_params(weight, bias, compute_dtype=jnp.bfloat16):
    """One-time transform of nn.Linear parameters for `linear_forward`.

    * Transpose the PyTorch-layout (out_dim, in_dim) weight to (in_dim, out_dim)
      so the kernel never contracts on the RHS last dim (no per-tile transpose).
    * Zero-pad out_dim to a lane multiple (128) -> unmasked lane-dense stores.
    * Cast the weight to the MXU compute dtype (bf16 default: half the weight
      HBM/VMEM traffic, full-rate MXU).  Bias stays f32 (seeds the f32 accum).
    """
    out_dim, in_dim = weight.shape
    n_pad = _round_up(out_dim, 128) - out_dim
    w_t = weight.T.astype(compute_dtype)          # (in_dim, out_dim)
    bias = bias.astype(jnp.float32)
    if n_pad:
        w_t = jnp.pad(w_t, ((0, 0), (0, n_pad)))
        bias = jnp.pad(bias, (0, n_pad))
    return w_t, bias.reshape(1, -1)


# ---------------------------------------------------------------------------
# Forward
# ---------------------------------------------------------------------------

def linear_forward(x, w_t, bias2d, out_dim, *, compute_dtype=jnp.bfloat16):
    """y = x @ W^T + b, with (w_t, bias2d) from prepare_linear_params.

    x: (B, in_dim) float; w_t: (in_dim, Np) compute_dtype; bias2d: (1, Np) f32.
    Returns (B, out_dim) float32 (matching the f32 nn.Linear reference).
    """
    B, K = x.shape
    Kw, Np = w_t.shape
    assert Kw == K, "x / weight in_dim mismatch"
    assert Np % 128 == 0, "weight must come from prepare_linear_params"

    # Batch (sublane) alignment: no-op when B % 8 == 0 (documented fast path).
    Mp = _round_up(B, 8)
    if Mp != B:
        x = jnp.pad(x, ((0, Mp - B), (0, 0)))

    x_bytes = x.dtype.itemsize
    w_bytes = w_t.dtype.itemsize
    o_bytes = 4  # f32 output

    cap = _tpu_vmem_capacity()
    budget = int(cap * 0.60)   # pipelined blocks: ~76 MiB v5e/v6e, ~38 MiB v7x

    tm = _pick_tile(Mp, 1024)
    tn = _pick_tile(Np, 1024)
    tk, k_tiled = K, False     # collapse K whenever it fits

    def blk_bytes(tm_, tn_, tk_, k_tiled_):
        out_copies = 1 if k_tiled_ else 2   # output block resident across K axis
        return (2 * tm_ * tk_ * x_bytes + 2 * tk_ * tn_ * w_bytes
                + 2 * tn_ * 4 + out_copies * tm_ * tn_ * o_bytes)

    # Budget loop: keep tiles 256-aligned (v6e/v7x MXUs) and K collapsed as long
    # as possible; prefer trading tk over the reuse-controlling tm/tn.
    while blk_bytes(tm, tn, tk, k_tiled) > budget:
        if tm > 256:
            tm = _pick_tile(Mp, tm // 2)
        elif tn > 256:
            tn = _pick_tile(Np, tn // 2)
        elif not k_tiled and K > 128 and K % 128 == 0:
            k_tiled, tk = True, _pick_tile(K, 2048)
        elif k_tiled and tk > 128:
            tk = _pick_tile(K, tk // 2)
        elif tm > 8:
            tm = _pick_tile(Mp, tm // 2)
        elif tn > 128:
            tn = _pick_tile(Np, tn // 2)
        else:
            break  # TODO(synk): K neither fits VMEM nor is 128-divisible; rely on vmem_limit slack

    # v7x: 2 TensorCores share the parallel grid axes — make sure at least one of
    # them has >= 2 blocks so both cores get work (near-free on 1-TC chips).
    if Mp // tm == 1 and Np // tn == 1 and tn >= 256:
        tn = _pick_tile(Np, tn // 2)

    gm, gn = Mp // tm, Np // tn

    if k_tiled:
        grid = (gm, gn, K // tk)
        in_specs = [
            pl.BlockSpec((tm, tk), lambda i, j, k: (i, k)),   # x tile
            pl.BlockSpec((tk, tn), lambda i, j, k: (k, j)),   # W^T tile (in, out)
            pl.BlockSpec((1, tn), lambda i, j, k: (0, j)),    # bias tile
        ]
        out_spec = pl.BlockSpec((tm, tn), lambda i, j, k: (i, j))
        kernel = functools.partial(_linear_kernel_ktiled, compute_dtype=compute_dtype)
        dim_sem = ("parallel", "parallel", "arbitrary")
    else:
        grid = (gm, gn)
        in_specs = [
            pl.BlockSpec((tm, tk), lambda i, j: (i, 0)),
            pl.BlockSpec((tk, tn), lambda i, j: (0, j)),
            pl.BlockSpec((1, tn), lambda i, j: (0, j)),
        ]
        out_spec = pl.BlockSpec((tm, tn), lambda i, j: (i, j))
        kernel = functools.partial(_linear_kernel, compute_dtype=compute_dtype)
        dim_sem = ("parallel", "parallel")

    cost = pl.CostEstimate(
        flops=2 * Mp * K * Np,
        transcendentals=0,
        # True streamed bytes incl. re-read factors (x per N-tile, W per M-tile).
        bytes_accessed=(Mp * K * x_bytes * gn + K * Np * w_bytes * gm
                        + Np * 4 * gm + Mp * Np * o_bytes),
    )

    out = pl.pallas_call(
        kernel,
        out_shape=jax.ShapeDtypeStruct((Mp, Np), jnp.float32),
        grid_spec=pltpu.PrefetchScalarGridSpec(
            num_scalar_prefetch=0,
            grid=grid,
            in_specs=in_specs,
            out_specs=out_spec,
        ),
        compiler_params=pltpu.CompilerParams(
            dimension_semantics=dim_sem,
            vmem_limit_bytes=int(cap * 3 // 4),
        ),
        cost_estimate=cost,
    )(x, w_t, bias2d)

    if (Mp, Np) != (B, out_dim):
        out = out[:B, :out_dim]
    return out


if __name__ == "__main__":
    # Shapes implied by LinearRegression(input_dim, output_dim) on a batch of vectors.
    B, input_dim, output_dim = 8, 32, 16

    key = jax.random.PRNGKey(0)
    kx, kw, kb = jax.random.split(key, 3)

    x = jax.random.normal(kx, (B, input_dim), dtype=jnp.float32)
    # Deterministic params mimicking nn.Linear's uniform(-1/sqrt(in), 1/sqrt(in)) init.
    bound = 1.0 / jnp.sqrt(jnp.float32(input_dim))
    weight = jax.random.uniform(kw, (output_dim, input_dim), dtype=jnp.float32,
                                minval=-bound, maxval=bound)
    bias = jax.random.uniform(kb, (output_dim,), dtype=jnp.float32,
                              minval=-bound, maxval=bound)

    ref = x @ weight.T + bias

    # Default deployment path: bf16 MXU operands, f32 accumulation.
    w_bf16, b2d = prepare_linear_params(weight, bias, compute_dtype=jnp.bfloat16)
    out = jax.block_until_ready(
        linear_forward(x, w_bf16, b2d, output_dim, compute_dtype=jnp.bfloat16))
    assert out.shape == (B, output_dim)
    assert jnp.allclose(out, ref, atol=2e-2, rtol=2e-2), "bf16 path mismatch"

    # f32-operand path (flagged, for callers that need closer-to-bit-exact results).
    w_f32, b2d32 = prepare_linear_params(weight, bias, compute_dtype=jnp.float32)
    out32 = jax.block_until_ready(
        linear_forward(x, w_f32, b2d32, output_dim, compute_dtype=jnp.float32))
    assert out32.shape == (B, output_dim)
    assert jnp.allclose(out32, ref, atol=2e-2, rtol=2e-2), "f32 path mismatch"

    print("KERNEL_OK")
</pallas_src>

<mosaic_0001>
module attributes {stable_mosaic.version = 11 : i64} {
  func.func @_linear_kernel(%arg0: i32, %arg1: i32, %arg2: memref<8x32xf32, #tpu.memory_space<vmem>>, %arg3: memref<32x128xbf16, #tpu.memory_space<vmem>>, %arg4: memref<1x128xf32, #tpu.memory_space<vmem>>, %arg5: memref<8x128xf32, #tpu.memory_space<vmem>>) attributes {dimension_semantics = [#tpu.dimension_semantics<parallel>, #tpu.dimension_semantics<parallel>], iteration_bounds = array<i64: 1, 1>, scalar_prefetch = 0 : i64, scratch_operands = 0 : i64, tpu.core_type = #tpu.core_type<tc>, window_params = [{transform_indices = @transform_0, window_bounds = array<i64: 8, 32>}, {transform_indices = @transform_1, window_bounds = array<i64: 32, 128>}, {transform_indices = @transform_2, window_bounds = array<i64: 1, 128>}, {transform_indices = @transform_3, window_bounds = array<i64: 8, 128>}]} {
    %c0 = arith.constant 0 : index
    %c0_0 = arith.constant 0 : index
    %0 = vector.load %arg2[%c0, %c0_0] : memref<8x32xf32, #tpu.memory_space<vmem>>, vector<8x32xf32>
    %1 = arith.truncf %0 : vector<8x32xf32> to vector<8x32xbf16>
    %c0_1 = arith.constant 0 : index
    %c0_2 = arith.constant 0 : index
    %2 = vector.load %arg3[%c0_1, %c0_2] : memref<32x128xbf16, #tpu.memory_space<vmem>>, vector<32x128xbf16>
    %cst = arith.constant dense<0.000000e+00> : vector<8x128xf32>
    %3 = tpu.matmul %1, %2, %cst {dimension_numbers = #tpu.dot_dimension_numbers<[1], [0], [0], [1], [0, 0, 1, 1], [], []>} : vector<8x32xbf16>, vector<32x128xbf16>, vector<8x128xf32> -> vector<8x128xf32>
    %c0_3 = arith.constant 0 : index
    %c0_4 = arith.constant 0 : index
    %4 = vector.load %arg4[%c0_3, %c0_4] : memref<1x128xf32, #tpu.memory_space<vmem>>, vector<1x128xf32>
    %5 = vector.broadcast %4 : vector<1x128xf32> to vector<8x128xf32>
    %6 = arith.addf %3, %5 : vector<8x128xf32>
    %c0_5 = arith.constant 0 : index
    %c0_6 = arith.constant 0 : index
    %7 = vector.load %arg5[%c0_5, %c0_6] : memref<8x128xf32, #tpu.memory_space<vmem>>, vector<8x128xf32>
    tpu.vector_store %arg5[%c0_5, %c0_6], %6 {strides = array<i32>} : memref<8x128xf32, #tpu.memory_space<vmem>>, vector<8x128xf32>,
    return
  }
  func.func @transform_0(%arg0: i32, %arg1: i32) -> (i32, i32) {
    %c0_i32 = arith.constant 0 : i32
    %c0_i32_0 = arith.constant 0 : i32
    return %arg0, %c0_i32 : i32, i32
  }
  func.func @transform_1(%arg0: i32, %arg1: i32) -> (i32, i32) {
    %c0_i32 = arith.constant 0 : i32
    %c0_i32_0 = arith.constant 0 : i32
    return %c0_i32, %arg1 : i32, i32
  }
  func.func @transform_2(%arg0: i32, %arg1: i32) -> (i32, i32) {
    %c0_i32 = arith.constant 0 : i32
    %c0_i32_0 = arith.constant 0 : i32
    return %c0_i32, %arg1 : i32, i32
  }
  func.func @transform_3(%arg0: i32, %arg1: i32) -> (i32, i32) {
    %c0_i32 = arith.constant 0 : i32
    return %arg0, %arg1 : i32, i32
  }
}

</mosaic_0001>

<bundles_post_ra>
// kernel: tpu_custom_call.1
= control target key start
LH: loop header
LB: loop body
LE: loop exit
PB: predicated region body
PF: predicated region fallthrough
CT: control target
= control target key end

     0   :  { %8 = vsyncpa [#allocation3], 0  ;;  %s257_s0 = inlined_call_operand.hbm [shape: f32[8,32], index: 0, kind: input, shape index: {}]   ;;  %s258_s1 = inlined_call_operand.hbm [shape: bf16[32,128], index: 1, kind: input, shape index: {}]   ;;  %s259_s2 = inlined_call_operand.vmem [shape: f32[1,128], index: 2, kind: input, shape index: {}]   ;;  %s260_s3 = inlined_call_operand.hbm [shape: f32[8,128], index: 3, kind: output, shape index: {}]  }
   0x1   :  { %9 = vsyncpa [#allocation6], 0 }
   0x2   :  { %10 = vsyncpa [#allocation4], 0  ;;  %s218_s12 = smov [#allocation2]   ;;  %s219_s14 = smov [#allocation5]  }
   0x3   :  { %s17_s13 = sshll.u32 %s218_s12, 4  ;;  %s26_s15 = sshll.u32 %s219_s14, 4  ;;  %s18_s13 = int_to_ptr.vmem [resolvable:$true] %s17_s13  ;;  %s27_s15 = int_to_ptr.vmem [resolvable:$true] %s26_s15 }
   0x4   :  { %s160_s16 = scalar_lea.vmem %s18_s13, 128  ;;  %p165_p1 = scmp.lt.s32.totalorder %s18_s13, %s18_s13 }
   0x5   :  { %p161_p0 = scmp.ne.s32.totalorder %s18_s13, %s160_s16  ;;  %p166_p2 = scmp.lt.s32.totalorder %s160_s16, %s160_s16 }
   0x7   :  { %p167_p3 = por %p166_p2, %p165_p1 }
   0x9   :  { %p168_p4 = pnand %p167_p3, %p161_p0 }
   0xb   :  { %171 = shalt.err (!%p168_p4)
}
   0xc   :  { %20 = dma.hbm_to_vmem [thread:$0]  %s257_s0, 128, %s18_s13, [#allocation3]  }
   0xd   :  { %s180_s19 = scalar_lea.vmem %s27_s15, 256  ;;  %p185_p6 = scmp.lt.s32.totalorder %s27_s15, %s27_s15 }
   0xe   :  { %p181_p5 = scmp.ne.s32.totalorder %s27_s15, %s180_s19  ;;  %p186_p7 = scmp.lt.s32.totalorder %s180_s19, %s180_s19 }
  0x10   :  { %p187_p8 = por %p186_p7, %p185_p6 }
  0x12   :  { %p188_p9 = pnand %p187_p8, %p181_p5 }
  0x14   :  { %191 = shalt.err (!%p188_p9)
}
  0x15   :  { %s220_s20 = smov 64   ;;  %s221_s21 = smov 4  }
  0x16   :  { %32 = dma.hbm_to_vmem [thread:$0]  %s258_s1, 256, %s27_s15, [#allocation6], %s220_s20, %s220_s20, %s221_s21  }
  0x17   :  { %212 = dma.done.wait [#allocation3], 128  }
  0x18   :  { %213 = vsyncadd [#allocation3], 4294967168 }
  0x19   :  { %214 = dma.done.wait [#allocation6], 256  }
  0x1a   :  { %215 = vsyncadd [#allocation6], 4294967040  ;;  %v222_v0 = vmov 0.0   ;;  %vm223_vm0 = vmmov 0   ;;  %v150_v1 = vld [vmem:[#allocation5 + $0x8] sm:$0xff]   ;;  %v151_v2 = vld [vmem:[#allocation5] sm:$0xff]  }
  0x1b   :  { %135 = vmatprep.subr.bf16.mxu0 %v222_v0  ;;  %139 = vmatprep.mubr.msk.bf16.mxu0 %vm223_vm0, %v222_v0  ;;  %v42_v3 = vld [vmem:[#allocation2] sm:$0xff]  ;;  %vm67_vm1 = vcmask 261120   ;;  %s224_s1 = smov [#allocation7]  }
  0x1c   :  { %136 = vmatpush3.bf16.msra.mxu0 %v150_v1  ;;  %v43_v4 = vpack.c.bf16 %v42_v3, %v42_v3  ;;  %v128_v5 = vld [vmem:[%s259_s2] ss:$0 sm:$0xff]  ;;  %s118_s25 = sshll.u32 %s224_s1, 4  ;;  %s119_s25 = int_to_ptr.vmem [resolvable:$true] %s118_s25 }
  0x1d   :  { %137 = vmatprep.subr.bf16.mxu0 %v222_v0  ;;  %s192_s26 = scalar_lea.vmem %s119_s25, 128  ;;  %p197_p11 = scmp.lt.s32.totalorder %s119_s25, %s119_s25 }
  0x1e   :  { %p193_p10 = scmp.ne.s32.totalorder %s119_s25, %s192_s26  ;;  %p198_p12 = scmp.lt.s32.totalorder %s192_s26, %s192_s26 }
  0x20   :  { %138 = vmatpush3.bf16.msra.mxu0 %v151_v2  ;;  %p199_p13 = por %p198_p12, %p197_p11 }
  0x22   :  { %p200_p0 = pnand %p199_p13, %p193_p10 }
  0x23   :  { %140 = vmatmul.mubr.msk.bf16.vlgmr.msra.gmra.mxu0 %vm67_vm1, %v43_v4 }
  0xe3   :  { %v105_v6 = vpop.f32.mrf.mxu0 }
  0xe4   :  { %v106_v7 = vadd.f32 %v128_v5, %v105_v6 }
  0xe5   :  { %v141_v8 = vpop.f32.mrf.mxu0 }
  0xe6   :  { %111 = vst [vmem:[#allocation7] sm:$0xff] %v106_v7 }
  0xe7   :  { %v108_v9 = vpop.f32.mrf.mxu0 }
  0xe8   :  { %203 = shalt.err (!%p200_p0)
}
  0xe9   :  { %121 = dma.vmem_to_hbm [thread:$0]  %s119_s25, 128, %s260_s3, [#allocation4]   ;;  %v142_v10 = vpop.f32.mrf.mxu0 }
  0xea   :  { %216 = dma.done.wait [#allocation4], 128  }
  0xeb   :  { %217 = vsyncadd [#allocation4], 4294967168 }
  0xec   :  { %125 = vsyncpa [#allocation3], 1 }
  0xed   :  { %126 = vsyncpa [#allocation6], 1 }
  0xee   :  { %127 = vsyncpa [#allocation4], 1 }

</bundles_post_ra>
